<compile_context>
chip_gen: v6e
topology: v6e:2x2x1
jax: 0.10.0
libtpu: 0.0.40
codegen_flags: <defaults>
</compile_context>

<pallas_src>
import functools

import jax
import jax.numpy as jnp
from jax.experimental import pallas as pl
from jax.experimental.pallas import tpu as pltpu


# Per-grid-step live VMEM budget (double-buffered x/out tiles + resident weights).
# ~13 MiB keeps headroom under v5e's 16 MiB default scoped VMEM; v6e/v7x default to
# 32 MiB scoped (64 MiB physical per TC on v7x), so the same budget is safe everywhere.
_VMEM_TILE_BUDGET = 13 * 1024 * 1024


def _round_up(x, m):
    return ((x + m - 1) // m) * m


def _group_factor(n):
    """Rows grouped per 128-lane output slab (1 => no grouping)."""
    if n < 128 and 128 % n == 0:
        return 128 // n
    # N that is already a multiple of 128 is lane-dense without grouping; otherwise we
    # fall back to an N-wide (masked-store) output block.
    # TODO(synk): lane-dense fallback for N not dividing 128 (zero-padded weight
    # columns) -- skipped because the extra output-extraction pass costs more HBM
    # traffic than the masked stores for the small N typical of this module.
    return 1


def _mh_linear_kernel(x_ref, w_ref, b_ref, o_ref):
    # x_ref: [TR, Dk]  streamed row block
    # w_ref: [Dk, Nk]  resident packed (block-diagonal) weights
    # b_ref: [1, Nk]   resident bias (f32)
    # o_ref: [TR, Nk]
    acc = jnp.dot(x_ref[...], w_ref[...], preferred_element_type=jnp.float32)
    o_ref[...] = (acc + b_ref[...]).astype(o_ref.dtype)


def pack_params(w, b, *, compute_dtype=jnp.float32):
    """Build the kernel-ready packed weights ONCE (hoisted out of forward).

    w: [K, output_dim, D]  (PyTorch nn.Linear weight layout, per hypothesis)
    b: [K, output_dim]
    Returns (w_in [G*D, G*N], b_in [1, G*N]) with N = K*output_dim and G the
    lane-dense row-grouping factor derived from N.
    """
    K, output_dim, D = w.shape
    N = K * output_dim
    G = _group_factor(N)
    w_packed = jnp.transpose(w, (2, 0, 1)).reshape(D, N).astype(compute_dtype)
    b_packed = b.reshape(N).astype(jnp.float32)  # bias is added to the f32 accumulator
    if G > 1:
        # Block-diagonal weight: group-slot g of a grouped input row maps to output
        # columns [g*N:(g+1)*N].
        eye = jnp.eye(G, dtype=compute_dtype)
        w_in = (eye[:, None, :, None] * w_packed[None, :, None, :]).reshape(G * D, G * N)
        b_in = jnp.tile(b_packed, G).reshape(1, G * N)
    else:
        w_in = w_packed
        b_in = b_packed.reshape(1, N)
    return w_in, b_in


@functools.partial(jax.jit, static_argnames=("num_hypothesis", "output_dim"))
def mh_localization_output(x, w_in, b_in, *, num_hypothesis, output_dim):
    """x: [batch, T, D] -> [batch, T, num_hypothesis, output_dim]."""
    batch, T, D = x.shape
    N = num_hypothesis * output_dim
    Dk, Nk = w_in.shape
    G = Dk // D
    assert Dk == G * D and Nk == G * N, "packed params do not match x / head dims"

    M = batch * T
    x_flat = x.reshape(M, D)                       # free row-major reshape under jit
    M_t = M
    if M % G != 0:
        # TODO(synk): rare tail case -- pads <G rows (one extra HBM pass over x);
        # common batch*T sizes are multiples of G and never hit this.
        pad = G - (M % G)
        x_flat = jnp.pad(x_flat, ((0, pad), (0, 0)))
        M_t = M + pad
    R = M_t // G
    x_in = x_flat.reshape(R, Dk)                   # free row-major regrouping

    # ---- row-tile size from an explicit VMEM budget ----
    x_item = jnp.dtype(x.dtype).itemsize
    w_bytes = (w_in.size * jnp.dtype(w_in.dtype).itemsize
               + b_in.size * jnp.dtype(b_in.dtype).itemsize)
    per_row = 2 * (Dk + Nk) * x_item               # double-buffered x & out tiles
    TR = max(8, (_VMEM_TILE_BUDGET - 2 * w_bytes) // per_row)
    TR -= TR % 8
    if R <= 8:
        TR = R                                     # full-extent block (valid by equality)
    else:
        # Guarantee >=2 row blocks so both v7x TensorCores get work (harmless on
        # single-core v5e/v6e: at most one extra ~0.35us grid step).
        TR = min(TR, max(8, _round_up(-(-R // 2), 8)))
    grid = (pl.cdiv(R, TR),)                       # last block may hang over the edge:
                                                   # OOB reads only feed OOB output rows,
                                                   # whose stores are dropped -> no padding.

    live_bytes = 2 * TR * (Dk + Nk) * x_item + 2 * w_bytes
    vmem_limit = int(min(48 * 1024 * 1024,
                         max(int(1.5 * live_bytes), 16 * 1024 * 1024)))

    out = pl.pallas_call(
        _mh_linear_kernel,
        out_shape=jax.ShapeDtypeStruct((R, Nk), x.dtype),
        grid_spec=pltpu.PrefetchScalarGridSpec(
            num_scalar_prefetch=0,
            grid=grid,
            in_specs=[
                pl.BlockSpec((TR, Dk), lambda i: (i, 0)),   # streamed row blocks
                # Constant index_map => fetched once, stays resident across the grid.
                # TODO(synk): pipeline_mode=pl.Buffered(1) would halve the (tiny)
                # weight double-buffer; skipped to keep lowering maximally portable.
                pl.BlockSpec((Dk, Nk), lambda i: (0, 0)),   # weights: resident
                pl.BlockSpec((1, Nk), lambda i: (0, 0)),    # bias: resident
            ],
            out_specs=pl.BlockSpec((TR, Nk), lambda i: (i, 0)),
        ),
        compiler_params=pltpu.CompilerParams(
            dimension_semantics=("parallel",),     # shard row blocks across v7x's 2 TCs
            vmem_limit_bytes=vmem_limit,
        ),
        cost_estimate=pl.CostEstimate(
            flops=int(2 * M * D * N),              # useful work (block-diag zeros excluded)
            transcendentals=0,
            bytes_accessed=int((R * Dk + R * Nk) * x_item + w_bytes),
        ),
    )(x_in, w_in, b_in)

    out_flat = out.reshape(M_t, N)                 # free row-major un-grouping
    if M_t != M:
        out_flat = out_flat[:M]                    # only in the rare padded-tail case
    return out_flat.reshape(batch, T, num_hypothesis, output_dim)


def init_params(key, input_dim, num_hypothesis, output_dim):
    """Deterministic synthetic init of the K Linear layers (PyTorch weight layout)."""
    kw, kb = jax.random.split(key)
    w = jax.random.normal(kw, (num_hypothesis, output_dim, input_dim), jnp.float32) * 0.1
    b = jax.random.normal(kb, (num_hypothesis, output_dim), jnp.float32) * 0.1
    return w, b


def _reference(x, w, b, num_hypothesis, output_dim):
    batch, T, D = x.shape
    x_flat = x.reshape(-1, D).astype(jnp.float32)
    return jnp.stack(
        [(x_flat @ w[k].astype(jnp.float32).T + b[k]).reshape(batch, T, output_dim)
         for k in range(num_hypothesis)],
        axis=-2,
    )


if __name__ == "__main__":
    key = jax.random.PRNGKey(0)
    kx, kp, k2, k3 = jax.random.split(key, 4)

    # --- Main check: module defaults (output_dim=2), lane-dense grouped path (N=16, G=8). ---
    batch, T, D = 2, 8, 32
    K, out_dim = 8, 2
    x = jax.random.normal(kx, (batch, T, D), jnp.float32)
    w, b = init_params(kp, D, K, out_dim)
    w_in, b_in = pack_params(w, b)
    out = jax.block_until_ready(
        mh_localization_output(x, w_in, b_in, num_hypothesis=K, output_dim=out_dim))
    ref = _reference(x, w, b, K, out_dim)
    assert out.shape == (batch, T, K, out_dim)
    assert jnp.allclose(out, ref, atol=1e-5, rtol=1e-5)

    # --- Ragged rows: M=80 -> R=10 grouped rows, TR=8, exercises the partial last block. ---
    x3 = jax.random.normal(k3, (2, 40, D), jnp.float32)
    out3 = jax.block_until_ready(
        mh_localization_output(x3, w_in, b_in, num_hypothesis=K, output_dim=out_dim))
    ref3 = _reference(x3, w, b, K, out_dim)
    assert out3.shape == (2, 40, K, out_dim)
    assert jnp.allclose(out3, ref3, atol=1e-5, rtol=1e-5)

    # --- bf16 fast path: weights cast once at pack time, x arrives in bf16, f32 accum. ---
    w_in_bf, b_in_bf = pack_params(w, b, compute_dtype=jnp.bfloat16)
    x_bf = x.astype(jnp.bfloat16)   # stands in for a bf16 upstream layer output
    out_bf = jax.block_until_ready(
        mh_localization_output(x_bf, w_in_bf, b_in_bf, num_hypothesis=K, output_dim=out_dim))
    assert out_bf.shape == (batch, T, K, out_dim) and out_bf.dtype == jnp.bfloat16
    assert jnp.allclose(out_bf.astype(jnp.float32), ref, atol=1e-1, rtol=1e-1)

    # --- Fallback path: N=15 does not divide 128 (no grouping, masked stores). ---
    K2, od2 = 5, 3
    w2, b2 = init_params(k2, D, K2, od2)
    w_in2, b_in2 = pack_params(w2, b2)
    out2 = jax.block_until_ready(
        mh_localization_output(x, w_in2, b_in2, num_hypothesis=K2, output_dim=od2))
    ref2 = _reference(x, w2, b2, K2, od2)
    assert out2.shape == (batch, T, K2, od2)
    assert jnp.allclose(out2, ref2, atol=1e-5, rtol=1e-5)

    print("KERNEL_OK")
</pallas_src>

<mosaic_0001>
module attributes {stable_mosaic.version = 11 : i64} {
  func.func @_mh_linear_kernel(%arg0: i32, %arg1: memref<2x256xf32, #tpu.memory_space<vmem>>, %arg2: memref<256x128xf32, #tpu.memory_space<vmem>>, %arg3: memref<1x128xf32, #tpu.memory_space<vmem>>, %arg4: memref<2x128xf32, #tpu.memory_space<vmem>>) attributes {dimension_semantics = [#tpu.dimension_semantics<parallel>], iteration_bounds = array<i64: 1>, scalar_prefetch = 0 : i64, scratch_operands = 0 : i64, tpu.core_type = #tpu.core_type<tc>, window_params = [{transform_indices = @transform_0, window_bounds = array<i64: 2, 256>}, {pipeline_mode = #tpu.pipeline_mode<synchronous>, transform_indices = @transform_1, window_bounds = array<i64: 256, 128>}, {pipeline_mode = #tpu.pipeline_mode<synchronous>, transform_indices = @transform_2, window_bounds = array<i64: 1, 128>}, {transform_indices = @transform_3, window_bounds = array<i64: 2, 128>}]} {
    %c0 = arith.constant 0 : index
    %c0_0 = arith.constant 0 : index
    %0 = vector.load %arg1[%c0, %c0_0] : memref<2x256xf32, #tpu.memory_space<vmem>>, vector<2x256xf32>
    %c0_1 = arith.constant 0 : index
    %c0_2 = arith.constant 0 : index
    %1 = vector.load %arg2[%c0_1, %c0_2] : memref<256x128xf32, #tpu.memory_space<vmem>>, vector<256x128xf32>
    %cst = arith.constant dense<0.000000e+00> : vector<2x128xf32>
    %2 = tpu.matmul %0, %1, %cst {dimension_numbers = #tpu.dot_dimension_numbers<[1], [0], [0], [1], [0, 0, 1, 1], [], []>} : vector<2x256xf32>, vector<256x128xf32>, vector<2x128xf32> -> vector<2x128xf32>
    %c0_3 = arith.constant 0 : index
    %c0_4 = arith.constant 0 : index
    %3 = vector.load %arg3[%c0_3, %c0_4] : memref<1x128xf32, #tpu.memory_space<vmem>>, vector<1x128xf32>
    %4 = vector.broadcast %3 : vector<1x128xf32> to vector<2x128xf32>
    %5 = arith.addf %2, %4 : vector<2x128xf32>
    %c0_5 = arith.constant 0 : index
    %c0_6 = arith.constant 0 : index
    %6 = vector.load %arg4[%c0_5, %c0_6] : memref<2x128xf32, #tpu.memory_space<vmem>>, vector<2x128xf32>
    tpu.vector_store %arg4[%c0_5, %c0_6], %5 {strides = array<i32>} : memref<2x128xf32, #tpu.memory_space<vmem>>, vector<2x128xf32>,
    return
  }
  func.func @transform_0(%arg0: i32) -> (i32, i32) {
    %c0_i32 = arith.constant 0 : i32
    %c0_i32_0 = arith.constant 0 : i32
    return %arg0, %c0_i32 : i32, i32
  }
  func.func @transform_1(%arg0: i32) -> (i32, i32) {
    %c0_i32 = arith.constant 0 : i32
    %c0_i32_0 = arith.constant 0 : i32
    %c0_i32_1 = arith.constant 0 : i32
    return %c0_i32, %c0_i32_0 : i32, i32
  }
  func.func @transform_2(%arg0: i32) -> (i32, i32) {
    %c0_i32 = arith.constant 0 : i32
    %c0_i32_0 = arith.constant 0 : i32
    %c0_i32_1 = arith.constant 0 : i32
    return %c0_i32, %c0_i32_0 : i32, i32
  }
  func.func @transform_3(%arg0: i32) -> (i32, i32) {
    %c0_i32 = arith.constant 0 : i32
    %c0_i32_0 = arith.constant 0 : i32
    return %arg0, %c0_i32 : i32, i32
  }
}

</mosaic_0001>

<bundles_post_ra>
// kernel: mh_localization_output.1
= control target key start
LH: loop header
LB: loop body
LE: loop exit
PB: predicated region body
PF: predicated region fallthrough
CT: control target
= control target key end

     0   :  { %8 = vsyncpa [#allocation3], 0  ;;  %s217_s12 = smov [#allocation2]   ;;  %s252_s0 = inlined_call_operand.vmem [shape: f32[2,256], index: 0, kind: input, shape index: {}]   ;;  %s253_s1 = inlined_call_operand.hbm [shape: f32[256,128], index: 1, kind: input, shape index: {}]   ;;  %s254_s2 = inlined_call_operand.vmem [shape: f32[1,128], index: 2, kind: input, shape index: {}]   ;;  %s255_s3 = inlined_call_operand.vmem [shape: f32[2,128], index: 3, kind: output, shape index: {}]  }
   0x1   :  { %s16_s13 = sshll.u32 %s217_s12, 4  ;;  %s17_s13 = int_to_ptr.vmem [resolvable:$true] %s16_s13 }
   0x2   :  { %s203_s14 = scalar_lea.vmem %s17_s13, 4096  ;;  %p208_p1 = scmp.lt.s32.totalorder %s17_s13, %s17_s13 }
   0x3   :  { %p204_p0 = scmp.ne.s32.totalorder %s17_s13, %s203_s14  ;;  %p209_p2 = scmp.lt.s32.totalorder %s203_s14, %s203_s14 }
   0x5   :  { %p210_p3 = por %p209_p2, %p208_p1 }
   0x7   :  { %p211_p4 = pnand %p210_p3, %p204_p0 }
   0x9   :  { %214 = shalt.err (!%p211_p4)
}
   0xa   :  { %s218_s15 = smov 128   ;;  %s219_s16 = smov 8  }
   0xb   :  { %22 = dma.hbm_to_vmem [thread:$0]  %s253_s1, 4096, %s17_s13, [#allocation3], %s218_s15, %s218_s15, %s219_s16  }
   0xc   :  { %215 = dma.done.wait [#allocation3], 4096  }
   0xd   :  { %216 = vsyncadd [#allocation3], 4294963200  ;;  %v60_v0 = vld [vmem:[#allocation2 + $0xf8] sm:$0xff]  ;;  %v59_v2 = vld [vmem:[#allocation2 + $0xf0] sm:$0xff] }
   0xe   :  { %v44_v1 = vld [vmem:[#allocation2 + $0x78] sm:$0xff]  ;;  %157 = vmatprep.subr.mxu0 %v60_v0  ;;  %v43_v3 = vld [vmem:[#allocation2 + $0x70] sm:$0xff]  ;;  %v58_v4 = vld [vmem:[#allocation2 + $0xe8] sm:$0xff] }
   0xf   :  { %158 = vmatpush3.msra.mxu0 %v44_v1  ;;  %v42_v5 = vld [vmem:[#allocation2 + $0x68] sm:$0xff]  ;;  %v57_v6 = vld [vmem:[#allocation2 + $0xe0] sm:$0xff]  ;;  %v56_v8 = vld [vmem:[#allocation2 + $0xd8] sm:$0xff] }
  0x10   :  { %159 = vmatprep.subr.mxu0 %v59_v2  ;;  %v41_v7 = vld [vmem:[#allocation2 + $0x60] sm:$0xff]  ;;  %v40_v9 = vld [vmem:[#allocation2 + $0x58] sm:$0xff]  ;;  %v55_v10 = vld [vmem:[#allocation2 + $0xd0] sm:$0xff] }
  0x11   :  { %160 = vmatpush3.msra.mxu0 %v43_v3  ;;  %v39_v11 = vld [vmem:[#allocation2 + $0x50] sm:$0xff]  ;;  %v54_v12 = vld [vmem:[#allocation2 + $0xc8] sm:$0xff]  ;;  %v156_v13 = vld.sshfl [vmem:[%s252_s0] sm:$0x33 pattern:$0x76325410] }
  0x12   :  { %161 = vmatprep.subr.mxu0 %v58_v4  ;;  %v38_v14 = vld [vmem:[#allocation2 + $0x48] sm:$0xff]  ;;  %v76_v15 = vcombine.high %v156_v13, %v156_v13  ;;  %v53_v16 = vld [vmem:[#allocation2 + $0xc0] sm:$0xff]  ;;  %v52_v18 = vld [vmem:[#allocation2 + $0xb8] sm:$0xff] }
  0x13   :  { %162 = vmatpush3.msra.mxu0 %v42_v5  ;;  %v37_v17 = vld [vmem:[#allocation2 + $0x40] sm:$0xff]  ;;  %v36_v19 = vld [vmem:[#allocation2 + $0x38] sm:$0xff]  ;;  %v51_v20 = vld [vmem:[#allocation2 + $0xb0] sm:$0xff] }
  0x14   :  { %163 = vmatprep.subr.mxu0 %v57_v6  ;;  %143 = vmatprep.mubr.f32.mxu0 %v76_v15  ;;  %v35_v21 = vld [vmem:[#allocation2 + $0x30] sm:$0xff]  ;;  %v50_v22 = vld [vmem:[#allocation2 + $0xa8] sm:$0xff]  ;;  %v49_v24 = vld [vmem:[#allocation2 + $0xa0] sm:$0xff] }
  0x15   :  { %164 = vmatpush3.msra.mxu0 %v41_v7  ;;  %v34_v23 = vld [vmem:[#allocation2 + $0x28] sm:$0xff]  ;;  %v33_v25 = vld [vmem:[#allocation2 + $0x20] sm:$0xff]  ;;  %v48_v26 = vld [vmem:[#allocation2 + $0x98] sm:$0xff] }
  0x16   :  { %165 = vmatprep.subr.mxu0 %v56_v8  ;;  %v32_v27 = vld [vmem:[#allocation2 + $0x18] sm:$0xff]  ;;  %v47_v28 = vld [vmem:[#allocation2 + $0x90] sm:$0xff]  ;;  %v46_v30 = vld [vmem:[#allocation2 + $0x88] sm:$0xff] }
  0x17   :  { %166 = vmatpush3.msra.mxu0 %v40_v9  ;;  %v31_v29 = vld [vmem:[#allocation2 + $0x10] sm:$0xff]  ;;  %v30_v31 = vld [vmem:[#allocation2 + $0x8] sm:$0xff]  ;;  %v45_v32 = vld [vmem:[#allocation2 + $0x80] sm:$0xff] }
  0x18   :  { %167 = vmatprep.subr.mxu0 %v55_v10  ;;  %v29_v33 = vld [vmem:[#allocation2] sm:$0xff] }
  0x19   :  { %168 = vmatpush3.msra.mxu0 %v39_v11  ;;  %v155_v35 = vld [vmem:[%s254_s2] ss:$0 sm:$0xff] }
  0x1a   :  { %169 = vmatprep.subr.mxu0 %v54_v12 }
  0x1b   :  { %170 = vmatpush3.msra.mxu0 %v38_v14 }
  0x1c   :  { %171 = vmatprep.subr.mxu0 %v53_v16 }
  0x1d   :  { %172 = vmatpush3.msra.mxu0 %v37_v17 }
  0x1e   :  { %173 = vmatprep.subr.mxu0 %v52_v18 }
  0x1f   :  { %174 = vmatpush3.msra.mxu0 %v36_v19 }
  0x20   :  { %175 = vmatprep.subr.mxu0 %v51_v20 }
  0x21   :  { %176 = vmatpush3.msra.mxu0 %v35_v21 }
  0x22   :  { %177 = vmatprep.subr.mxu0 %v50_v22 }
  0x23   :  { %178 = vmatpush3.msra.mxu0 %v34_v23 }
  0x24   :  { %179 = vmatprep.subr.mxu0 %v49_v24 }
  0x25   :  { %180 = vmatpush3.msra.mxu0 %v33_v25 }
  0x26   :  { %181 = vmatprep.subr.mxu0 %v48_v26 }
  0x27   :  { %182 = vmatpush3.msra.mxu0 %v32_v27 }
  0x28   :  { %183 = vmatprep.subr.mxu0 %v47_v28 }
  0x29   :  { %184 = vmatpush3.msra.mxu0 %v31_v29 }
  0x2a   :  { %185 = vmatprep.subr.mxu0 %v46_v30 }
  0x2b   :  { %186 = vmatpush3.msra.mxu0 %v30_v31 }
  0x2c   :  { %187 = vmatprep.subr.mxu0 %v45_v32 }
  0x2d   :  { %188 = vmatpush3.msra.mxu0 %v29_v33 }
  0x2e   :  { %144 = vmatmul.mubr.f32.vlgmr.msra.gmra.mxu0 %v156_v13 }
  0xee   :  { %v189_v34 = vpop.f32.mrf.mxu0 }
  0xf0   :  { %v190_v36 = vpop.f32.mrf.mxu0 }
  0xf1   :  { %v191_v37 = vadd.f32 %v190_v36, %v189_v34 }
  0xf3   :  { %v146_v38 = vadd.f32 %v191_v37, %v155_v35 }
  0xf5   :  { %149 = vst [vmem:[%s255_s3] sm:$0x3] %v146_v38 }
  0xf6   :  { %154 = vsyncpa [#allocation3], 1 }

</bundles_post_ra>
